<compile_context>
chip_gen: v5e
topology: v5e:2x2
jax: 0.10.0
libtpu: 0.0.40
codegen_flags: <defaults>
</compile_context>

<pallas_src>
import jax
import jax.numpy as jnp
import numpy as np
from jax.experimental import pallas as pl
from jax.experimental.pallas import tpu as pltpu

# ----------------------------- sizes ---------------------------------------
B = 2                 # batch
D_EMP = 32            # employee embedding dim
H = 4                 # number of history / gen-game slots (== rollout length)
D_GAME = 16           # per-game embedding dim
D_HIS = H * D_GAME    # 64
HIDDEN = 64
N_GAMES = 128         # actor output = logits over the game table
X_W = 256             # packed activation / output slab width (multiple of 128)

# lane offsets inside the packed activation slab
EMP_OFF = 0
HIS_OFF = D_EMP                    # 32
GEN_OFF = D_EMP + D_HIS            # 96
HISD_OFF = D_EMP + 2 * D_HIS       # 160

# row offsets inside the packed weight slab
W1_R = 0        # fused layer-1 weights          [256, 128]  (cols 0:64 actor, 64:128 critic)
W2_R = 256      # actor layer-2 weights          [64, 128]
GAMES_R = 320   # game table, tiled every 16 ln  [128, 256]
CW1H_R = 448    # critic his_dis weights         [64, 64]
MISC_R = 512    # biases + critic head           [8, 256]
WP_ROWS = 520


# --------------------------- shared kernel core ------------------------------
def _forward_core(step, x, wp_ref):
    """One ActorCritic step on the packed slabs. Returns (logits, x_new, value)."""
    misc = wp_ref[MISC_R:MISC_R + 8, :]                         # [8, 256] biases + head

    # ---- fused layer-1: actor (cols 0:64) + critic pre-update part (cols 64:128)
    #      -> ONE MXU push over the packed activation slab ----
    h12 = jnp.dot(x, wp_ref[W1_R:W1_R + X_W, 0:2 * HIDDEN],
                  preferred_element_type=jnp.float32)           # [B, 128]
    h12 = h12 + misc[0:1, 0:2 * HIDDEN]                         # packed (a_b1 | c_b1)
    a_h = jnp.tanh(h12[:, 0:HIDDEN])                            # actor hidden
    c_pre = h12[:, HIDDEN:2 * HIDDEN]                           # critic hidden pre (old his_dis)

    # ---- actor layer-2 -> logits (action_pred) ----
    logits = (jnp.dot(a_h, wp_ref[W2_R:W2_R + HIDDEN, 0:N_GAMES],
                      preferred_element_type=jnp.float32)
              + misc[1:2, 0:N_GAMES])                           # [B, N_GAMES]

    # ---- compute_action_prob: first-occurrence argmax -> one-hot ----
    m = jnp.max(logits, axis=-1, keepdims=True)
    g_iota = jax.lax.broadcasted_iota(jnp.int32, (B, N_GAMES), 1)
    first = jnp.min(jnp.where(logits == m, g_iota, N_GAMES), axis=-1, keepdims=True)
    onehot = (g_iota == first).astype(jnp.float32)              # [B, N_GAMES]

    # ---- gather selected game embedding on the MXU; the table is tiled every
    #      D_GAME lanes so the result is slot-aligned for every lane region ----
    sel = jnp.dot(onehot, wp_ref[GAMES_R:GAMES_R + N_GAMES, :],
                  preferred_element_type=jnp.float32)           # [B, X_W]

    # ---- update_input_tensors: write selected game into slot `step` of both
    #      the gen_games region and the his_dis region of the slab ----
    lane = jax.lax.broadcasted_iota(jnp.int32, (B, X_W), 1)
    g0 = GEN_OFF + step * D_GAME
    d0 = HISD_OFF + step * D_GAME
    upd = ((lane >= g0) & (lane < g0 + D_GAME)) | ((lane >= d0) & (lane < d0 + D_GAME))
    x_new = jnp.where(upd, sel, x)                              # [B, X_W]

    # ---- critic: only the slot-delta correction sits after the argmax ----
    delta = x_new[:, HISD_OFF:HISD_OFF + D_HIS] - x[:, HISD_OFF:HISD_OFF + D_HIS]
    corr = jnp.dot(delta, wp_ref[CW1H_R:CW1H_R + D_HIS, 0:HIDDEN],
                   preferred_element_type=jnp.float32)          # [B, HIDDEN]
    c_h = jnp.tanh(c_pre + corr)
    value = (jnp.sum(c_h * misc[2:3, 0:HIDDEN], axis=-1, keepdims=True)
             + misc[2:3, HIDDEN:HIDDEN + 1])                    # [B, 1]
    return logits, x_new, value


def _store_out(o_ref, logits, x_new, value):
    """Pack the three results into one lane-dense [B, 256] output slab."""
    o_ref[:, 0:N_GAMES] = logits
    o_ref[:, N_GAMES:N_GAMES + D_HIS] = x_new[:, GEN_OFF:GEN_OFF + D_HIS]
    o_ref[:, N_GAMES + D_HIS:X_W] = jnp.broadcast_to(value, (B, X_W - N_GAMES - D_HIS))


# --------------------------- single-step kernel ------------------------------
def actor_critic_step_kernel(step_ref, x_ref, wp_ref, out_ref):
    logits, x_new, value = _forward_core(step_ref[0], x_ref[...], wp_ref)
    _store_out(out_ref, logits, x_new, value)


_single_step_call = pl.pallas_call(
    actor_critic_step_kernel,
    out_shape=jax.ShapeDtypeStruct((B, X_W), jnp.float32),
    in_specs=[pl.BlockSpec(memory_space=pltpu.MemorySpace.SMEM),   # step scalar
              pl.BlockSpec(memory_space=pltpu.MemorySpace.VMEM),   # activation slab
              pl.BlockSpec(memory_space=pltpu.MemorySpace.VMEM)],  # weight slab
    out_specs=pl.BlockSpec(memory_space=pltpu.MemorySpace.VMEM),
    cost_estimate=pl.CostEstimate(flops=311_296, transcendentals=256,
                                  bytes_accessed=536_576),
)


# ------------------------- rollout kernel (grid=(H,)) ------------------------
def actor_critic_rollout_kernel(x0_ref, wp_ref, out_ref, xs_ref):
    t = pl.program_id(0)

    @pl.when(t == 0)
    def _():
        xs_ref[...] = x0_ref[...]          # initialize resident state slab

    logits, x_new, value = _forward_core(t, xs_ref[...], wp_ref)
    xs_ref[...] = x_new                    # carry gen / his_dis state in VMEM
    _store_out(out_ref.at[0], logits, x_new, value)


_rollout_call = pl.pallas_call(
    actor_critic_rollout_kernel,
    out_shape=jax.ShapeDtypeStruct((H, B, X_W), jnp.float32),
    grid=(H,),
    in_specs=[pl.BlockSpec((B, X_W), lambda t: (0, 0)),        # resident across steps
              pl.BlockSpec((WP_ROWS, X_W), lambda t: (0, 0))], # weights DMA'd once
    out_specs=pl.BlockSpec((1, B, X_W), lambda t: (t, 0, 0)),
    scratch_shapes=[pltpu.VMEM((B, X_W), jnp.float32)],
    compiler_params=pltpu.CompilerParams(dimension_semantics=("arbitrary",)),
    cost_estimate=pl.CostEstimate(flops=H * 311_296, transcendentals=H * 256,
                                  bytes_accessed=544_768),
)


# ------------------------------ packing helpers ------------------------------
def pack_x(emp, his, gen_flat, hisd_flat):
    pad = jnp.zeros((B, X_W - (D_EMP + 3 * D_HIS)), jnp.float32)
    return jnp.concatenate([emp, his, gen_flat, hisd_flat, pad], axis=-1)


def pack_weights(params, all_games):
    """Build the single resident weight slab [520, 256] (done once at init)."""
    wp = jnp.zeros((WP_ROWS, X_W), jnp.float32)
    # fused layer-1: cols 0:64 actor hidden, cols 64:128 critic hidden
    wp = wp.at[EMP_OFF:EMP_OFF + D_EMP, 0:HIDDEN].set(params["a_w1_emp"])
    wp = wp.at[HIS_OFF:HIS_OFF + D_HIS, 0:HIDDEN].set(params["a_w1_his"])
    wp = wp.at[GEN_OFF:GEN_OFF + D_HIS, 0:HIDDEN].set(params["a_w1_gen"])
    wp = wp.at[EMP_OFF:EMP_OFF + D_EMP, HIDDEN:2 * HIDDEN].set(params["c_w1_emp"])
    wp = wp.at[HISD_OFF:HISD_OFF + D_HIS, HIDDEN:2 * HIDDEN].set(params["c_w1_his"])
    # actor layer-2
    wp = wp.at[W2_R:W2_R + HIDDEN, 0:N_GAMES].set(params["a_w2"])
    # game table, embedding tiled every D_GAME lanes across the slab width
    wp = wp.at[GAMES_R:GAMES_R + N_GAMES, :].set(jnp.tile(all_games, (1, X_W // D_GAME)))
    # critic his_dis weights (for the post-argmax slot-delta correction)
    wp = wp.at[CW1H_R:CW1H_R + D_HIS, 0:HIDDEN].set(params["c_w1_his"])
    # biases + critic head
    wp = wp.at[MISC_R, 0:HIDDEN].set(params["a_b1"][0])
    wp = wp.at[MISC_R, HIDDEN:2 * HIDDEN].set(params["c_b1"][0])
    wp = wp.at[MISC_R + 1, 0:N_GAMES].set(params["a_b2"][0])
    wp = wp.at[MISC_R + 2, 0:HIDDEN].set(params["c_w2_row"][0])
    wp = wp.at[MISC_R + 2, HIDDEN].set(params["c_b2"][0, 0])
    return wp


# ------------------------------ wrappers -------------------------------------
@jax.jit
def actor_critic_forward(wp, employee_embeddings, his_embeddings,
                         gen_games, his_embed_, step):
    """Module-faithful single-step forward (step is a traced int32 in SMEM)."""
    x = pack_x(employee_embeddings, his_embeddings,
               gen_games.reshape(B, D_HIS), his_embed_.reshape(B, D_HIS))
    out = _single_step_call(step, x, wp)
    action_pred = out[:, 0:N_GAMES]
    gen_new = out[:, N_GAMES:N_GAMES + D_HIS].reshape(B, H, D_GAME)
    value_pred = out[:, N_GAMES + D_HIS:N_GAMES + D_HIS + 1]
    return action_pred, value_pred, gen_new


@jax.jit
def actor_critic_rollout(wp, employee_embeddings, his_embeddings,
                         gen_games, his_embed_):
    """Whole rollout (step = 0..H-1) in ONE kernel launch with resident weights."""
    x0 = pack_x(employee_embeddings, his_embeddings,
                gen_games.reshape(B, D_HIS), his_embed_.reshape(B, D_HIS))
    out = _rollout_call(x0, wp)                                  # [H, B, 256]
    action_preds = out[:, :, 0:N_GAMES]                          # [H, B, 128]
    value_preds = out[:, :, N_GAMES + D_HIS:N_GAMES + D_HIS + 1] # [H, B, 1]
    gen_final = out[H - 1, :, N_GAMES:N_GAMES + D_HIS].reshape(B, H, D_GAME)
    return action_preds, value_preds, gen_final


# ------------------------- pure-JAX reference --------------------------------
def reference_forward(params, all_games, emp, his, gen, hisd, step_i):
    a_w1 = jnp.concatenate(
        [params["a_w1_emp"], params["a_w1_his"], params["a_w1_gen"]], axis=0)
    x = jnp.concatenate([emp, his, gen.reshape(B, -1)], axis=-1)
    h = jnp.tanh(x @ a_w1 + params["a_b1"])
    logits = h @ params["a_w2"] + params["a_b2"]
    idx = jnp.argmax(logits, axis=-1)
    sel = all_games[idx]
    his_dis = hisd.at[:, step_i, :].set(sel)
    gen_new = gen.at[:, step_i, :].set(sel)
    c_w1 = jnp.concatenate([params["c_w1_emp"], params["c_w1_his"]], axis=0)
    cx = jnp.concatenate([emp, his_dis.reshape(B, -1)], axis=-1)
    hc = jnp.tanh(cx @ c_w1 + params["c_b1"])
    value = hc @ params["c_w2_row"].T + params["c_b2"]
    return logits, value, gen_new, his_dis


def reference_rollout(params, all_games, emp, his, gen, hisd):
    logits_all, values_all = [], []
    for t in range(H):
        logits, value, gen, hisd = reference_forward(
            params, all_games, emp, his, gen, hisd, t)
        logits_all.append(logits)
        values_all.append(value)
    return jnp.stack(logits_all), jnp.stack(values_all), gen


# ------------------------------ main ----------------------------------------
if __name__ == "__main__":
    key = jax.random.PRNGKey(0)
    keys = jax.random.split(key, 16)

    # Deterministic synthetic parameters (first-layer weights created
    # full-width and split row-wise so fused-kernel math is identical to
    # dotting against the concatenated input).
    a_w1 = 0.05 * jax.random.normal(keys[0], (D_EMP + 2 * D_HIS, HIDDEN), jnp.float32)
    c_w1 = 0.05 * jax.random.normal(keys[4], (D_EMP + D_HIS, HIDDEN), jnp.float32)
    c_w2 = 0.05 * jax.random.normal(keys[6], (HIDDEN, 1), jnp.float32)
    params = {
        "a_w1_emp": a_w1[:D_EMP],
        "a_w1_his": a_w1[D_EMP:D_EMP + D_HIS],
        "a_w1_gen": a_w1[D_EMP + D_HIS:],
        "a_b1": 0.01 * jax.random.normal(keys[1], (1, HIDDEN), jnp.float32),
        "a_w2": 0.05 * jax.random.normal(keys[2], (HIDDEN, N_GAMES), jnp.float32),
        "a_b2": 0.01 * jax.random.normal(keys[3], (1, N_GAMES), jnp.float32),
        "c_w1_emp": c_w1[:D_EMP],
        "c_w1_his": c_w1[D_EMP:],
        "c_b1": 0.01 * jax.random.normal(keys[5], (1, HIDDEN), jnp.float32),
        "c_w2_row": c_w2.T,
        "c_b2": 0.01 * jax.random.normal(keys[7], (1, 1), jnp.float32),
    }

    # Synthetic game table (stand-in for all_games.pt).
    all_games = jax.random.normal(keys[8], (N_GAMES, D_GAME), jnp.float32)

    # Pack everything once (resident weight slab).
    wp = pack_weights(params, all_games)

    # Example inputs.
    employee_embeddings = jax.random.normal(keys[9], (B, D_EMP), jnp.float32)
    his_embeddings = jax.random.normal(keys[10], (B, D_HIS), jnp.float32)
    gen_games = jax.random.normal(keys[11], (B, H, D_GAME), jnp.float32)
    his_embed_ = jax.random.normal(keys[12], (B, H, D_GAME), jnp.float32)
    step = jnp.array([1], jnp.int32)

    # ---- single-step (module-faithful) forward ----
    action_pred, value_pred, gen_games_out = actor_critic_forward(
        wp, employee_embeddings, his_embeddings, gen_games, his_embed_, step)
    jax.block_until_ready((action_pred, value_pred, gen_games_out))

    assert action_pred.shape == (B, N_GAMES)
    assert value_pred.shape == (B, 1)
    assert gen_games_out.shape == (B, H, D_GAME)

    ref_logits, ref_value, ref_gen, _ = reference_forward(
        params, all_games, employee_embeddings, his_embeddings,
        gen_games, his_embed_, int(step[0]))
    np.testing.assert_allclose(np.asarray(action_pred), np.asarray(ref_logits),
                               rtol=1e-3, atol=1e-3)
    np.testing.assert_allclose(np.asarray(value_pred), np.asarray(ref_value),
                               rtol=1e-3, atol=1e-3)
    np.testing.assert_allclose(np.asarray(gen_games_out), np.asarray(ref_gen),
                               rtol=1e-3, atol=1e-3)

    # ---- folded rollout: step=0..H-1 in one launch with resident weights ----
    roll_logits, roll_values, roll_gen = actor_critic_rollout(
        wp, employee_embeddings, his_embeddings, gen_games, his_embed_)
    jax.block_until_ready((roll_logits, roll_values, roll_gen))

    ref_roll_logits, ref_roll_values, ref_roll_gen = reference_rollout(
        params, all_games, employee_embeddings, his_embeddings, gen_games, his_embed_)
    np.testing.assert_allclose(np.asarray(roll_logits), np.asarray(ref_roll_logits),
                               rtol=1e-3, atol=1e-3)
    np.testing.assert_allclose(np.asarray(roll_values), np.asarray(ref_roll_values),
                               rtol=1e-3, atol=1e-3)
    np.testing.assert_allclose(np.asarray(roll_gen), np.asarray(ref_roll_gen),
                               rtol=1e-3, atol=1e-3)

    print("KERNEL_OK")
</pallas_src>

<mosaic_0001>
module attributes {stable_mosaic.version = 11 : i64} {
  func.func @actor_critic_step_kernel(%arg0: memref<1xi32, #tpu.memory_space<smem>>, %arg1: memref<2x256xf32, #tpu.memory_space<vmem>>, %arg2: memref<520x256xf32, #tpu.memory_space<vmem>>, %arg3: memref<2x256xf32, #tpu.memory_space<vmem>>) attributes {dimension_semantics = [], scalar_prefetch = 0 : i64, scratch_operands = 0 : i64, tpu.core_type = #tpu.core_type<tc>} {
    %c0 = arith.constant 0 : index
    %0 = memref.load %arg0[%c0] : memref<1xi32, #tpu.memory_space<smem>>
    %c0_0 = arith.constant 0 : index
    %c0_1 = arith.constant 0 : index
    %1 = vector.load %arg1[%c0_0, %c0_1] : memref<2x256xf32, #tpu.memory_space<vmem>>, vector<2x256xf32>
    %c512 = arith.constant 512 : index
    %c0_2 = arith.constant 0 : index
    %2 = vector.load %arg2[%c512, %c0_2] : memref<520x256xf32, #tpu.memory_space<vmem>>, vector<8x256xf32>
    %c0_3 = arith.constant 0 : index
    %c0_4 = arith.constant 0 : index
    %3 = vector.load %arg2[%c0_3, %c0_4] : memref<520x256xf32, #tpu.memory_space<vmem>>, vector<256x128xf32>
    %cst = arith.constant dense<0.000000e+00> : vector<2x128xf32>
    %4 = tpu.matmul %1, %3, %cst {dimension_numbers = #tpu.dot_dimension_numbers<[1], [0], [0], [1], [0, 0, 1, 1], [], []>} : vector<2x256xf32>, vector<256x128xf32>, vector<2x128xf32> -> vector<2x128xf32>
    %5 = vector.extract_strided_slice %2 {offsets = [0, 0], sizes = [1, 128], strides = [1, 1]} : vector<8x256xf32> to vector<1x128xf32>
    %6 = vector.broadcast %5 : vector<1x128xf32> to vector<2x128xf32>
    %7 = arith.addf %4, %6 : vector<2x128xf32>
    %8 = vector.extract_strided_slice %7 {offsets = [0, 0], sizes = [2, 64], strides = [1, 1]} : vector<2x128xf32> to vector<2x64xf32>
    %9 = math.tanh %8 : vector<2x64xf32>
    %10 = vector.extract_strided_slice %7 {offsets = [0, 64], sizes = [2, 64], strides = [1, 1]} : vector<2x128xf32> to vector<2x64xf32>
    %c256 = arith.constant 256 : index
    %c0_5 = arith.constant 0 : index
    %11 = vector.load %arg2[%c256, %c0_5] : memref<520x256xf32, #tpu.memory_space<vmem>>, vector<64x128xf32>
    %cst_6 = arith.constant dense<0.000000e+00> : vector<2x128xf32>
    %12 = tpu.matmul %9, %11, %cst_6 {dimension_numbers = #tpu.dot_dimension_numbers<[1], [0], [0], [1], [0, 0, 1, 1], [], []>} : vector<2x64xf32>, vector<64x128xf32>, vector<2x128xf32> -> vector<2x128xf32>
    %13 = vector.extract_strided_slice %2 {offsets = [1, 0], sizes = [1, 128], strides = [1, 1]} : vector<8x256xf32> to vector<1x128xf32>
    %14 = vector.broadcast %13 : vector<1x128xf32> to vector<2x128xf32>
    %15 = arith.addf %12, %14 : vector<2x128xf32>
    %cst_7 = arith.constant dense<0xFF800000> : vector<2xf32>
    %16 = vector.multi_reduction <maximumf>, %15, %cst_7 [1] : vector<2x128xf32> to vector<2xf32>
    %17 = vector.shape_cast %16 : vector<2xf32> to vector<2x1xf32>
    %18 = tpu.iota {dimensions = array<i32: 1>} : vector<2x128xi32>
    %19 = vector.broadcast %17 : vector<2x1xf32> to vector<2x128xf32>
    %20 = arith.cmpf oeq, %15, %19 : vector<2x128xf32>
    %c128_i32 = arith.constant 128 : i32
    %21 = vector.broadcast %c128_i32 : i32 to vector<2x128xi32>
    %22 = arith.select %20, %18, %21 : vector<2x128xi1>, vector<2x128xi32>
    %cst_8 = arith.constant dense<2147483647> : vector<2xi32>
    %23 = vector.multi_reduction <minsi>, %22, %cst_8 [1] : vector<2x128xi32> to vector<2xi32>
    %24 = vector.shape_cast %23 : vector<2xi32> to vector<2x1xi32>
    %25 = vector.broadcast %24 : vector<2x1xi32> to vector<2x128xi32>
    %26 = arith.cmpi eq, %18, %25 : vector<2x128xi32>
    %27 = arith.extui %26 : vector<2x128xi1> to vector<2x128xi32>
    %28 = arith.sitofp %27 : vector<2x128xi32> to vector<2x128xf32>
    %c320 = arith.constant 320 : index
    %c0_9 = arith.constant 0 : index
    %29 = vector.load %arg2[%c320, %c0_9] : memref<520x256xf32, #tpu.memory_space<vmem>>, vector<128x256xf32>
    %cst_10 = arith.constant dense<0.000000e+00> : vector<2x256xf32>
    %30 = tpu.matmul %28, %29, %cst_10 {dimension_numbers = #tpu.dot_dimension_numbers<[1], [0], [0], [1], [0, 0, 1, 1], [], []>} : vector<2x128xf32>, vector<128x256xf32>, vector<2x256xf32> -> vector<2x256xf32>
    %31 = tpu.iota {dimensions = array<i32: 1>} : vector<2x256xi32>
    %c16_i32 = arith.constant 16 : i32
    %32 = arith.muli %0, %c16_i32 : i32
    %c96_i32 = arith.constant 96 : i32
    %33 = arith.addi %c96_i32, %32 : i32
    %c16_i32_11 = arith.constant 16 : i32
    %34 = arith.muli %0, %c16_i32_11 : i32
    %c160_i32 = arith.constant 160 : i32
    %35 = arith.addi %c160_i32, %34 : i32
    %36 = vector.broadcast %33 : i32 to vector<2x256xi32>
    %37 = arith.cmpi sge, %31, %36 : vector<2x256xi32>
    %c16_i32_12 = arith.constant 16 : i32
    %38 = arith.addi %33, %c16_i32_12 : i32
    %39 = vector.broadcast %38 : i32 to vector<2x256xi32>
    %40 = arith.cmpi slt, %31, %39 : vector<2x256xi32>
    %41 = arith.andi %37, %40 : vector<2x256xi1>
    %42 = vector.broadcast %35 : i32 to vector<2x256xi32>
    %43 = arith.cmpi sge, %31, %42 : vector<2x256xi32>
    %c16_i32_13 = arith.constant 16 : i32
    %44 = arith.addi %35, %c16_i32_13 : i32
    %45 = vector.broadcast %44 : i32 to vector<2x256xi32>
    %46 = arith.cmpi slt, %31, %45 : vector<2x256xi32>
    %47 = arith.andi %43, %46 : vector<2x256xi1>
    %48 = arith.ori %41, %47 : vector<2x256xi1>
    %49 = arith.select %48, %30, %1 : vector<2x256xi1>, vector<2x256xf32>
    %50 = vector.extract_strided_slice %49 {offsets = [0, 160], sizes = [2, 64], strides = [1, 1]} : vector<2x256xf32> to vector<2x64xf32>
    %51 = vector.extract_strided_slice %1 {offsets = [0, 160], sizes = [2, 64], strides = [1, 1]} : vector<2x256xf32> to vector<2x64xf32>
    %52 = arith.subf %50, %51 : vector<2x64xf32>
    %c448 = arith.constant 448 : index
    %c0_14 = arith.constant 0 : index
    %53 = vector.load %arg2[%c448, %c0_14] : memref<520x256xf32, #tpu.memory_space<vmem>>, vector<64x64xf32>
    %cst_15 = arith.constant dense<0.000000e+00> : vector<2x64xf32>
    %54 = tpu.matmul %52, %53, %cst_15 {dimension_numbers = #tpu.dot_dimension_numbers<[1], [0], [0], [1], [0, 0, 1, 1], [], []>} : vector<2x64xf32>, vector<64x64xf32>, vector<2x64xf32> -> vector<2x64xf32>
    %55 = arith.addf %10, %54 : vector<2x64xf32>
    %56 = math.tanh %55 : vector<2x64xf32>
    %57 = vector.extract_strided_slice %2 {offsets = [2, 0], sizes = [1, 64], strides = [1, 1]} : vector<8x256xf32> to vector<1x64xf32>
    %58 = vector.broadcast %57 : vector<1x64xf32> to vector<2x64xf32>
    %59 = arith.mulf %56, %58 : vector<2x64xf32>
    %cst_16 = arith.constant dense<0.000000e+00> : vector<2xf32>
    %60 = vector.multi_reduction <add>, %59, %cst_16 [1] : vector<2x64xf32> to vector<2xf32>
    %61 = vector.shape_cast %60 : vector<2xf32> to vector<2x1xf32>
    %62 = vector.extract_strided_slice %2 {offsets = [2, 64], sizes = [1, 1], strides = [1, 1]} : vector<8x256xf32> to vector<1x1xf32>
    %63 = vector.broadcast %62 : vector<1x1xf32> to vector<2x1xf32>
    %64 = arith.addf %61, %63 : vector<2x1xf32>
    %c0_17 = arith.constant 0 : index
    %c0_18 = arith.constant 0 : index
    %65 = vector.load %arg3[%c0_17, %c0_18] : memref<2x256xf32, #tpu.memory_space<vmem>>, vector<2x128xf32>
    tpu.vector_store %arg3[%c0_17, %c0_18], %15 {strides = array<i32>} : memref<2x256xf32, #tpu.memory_space<vmem>>, vector<2x128xf32>,
    %66 = vector.extract_strided_slice %49 {offsets = [0, 96], sizes = [2, 64], strides = [1, 1]} : vector<2x256xf32> to vector<2x64xf32>
    %c0_19 = arith.constant 0 : index
    %c128 = arith.constant 128 : index
    %67 = vector.load %arg3[%c0_19, %c128] : memref<2x256xf32, #tpu.memory_space<vmem>>, vector<2x64xf32>
    tpu.vector_store %arg3[%c0_19, %c128], %66 {strides = array<i32>} : memref<2x256xf32, #tpu.memory_space<vmem>>, vector<2x64xf32>,
    %68 = vector.shape_cast %64 : vector<2x1xf32> to vector<2x1xf32>
    %69 = vector.broadcast %68 : vector<2x1xf32> to vector<2x64xf32>
    %c0_20 = arith.constant 0 : index
    %c192 = arith.constant 192 : index
    %70 = vector.load %arg3[%c0_20, %c192] : memref<2x256xf32, #tpu.memory_space<vmem>>, vector<2x64xf32>
    tpu.vector_store %arg3[%c0_20, %c192], %69 {strides = array<i32>} : memref<2x256xf32, #tpu.memory_space<vmem>>, vector<2x64xf32>,
    return
  }
}

</mosaic_0001>

<bundles_post_ra>
// kernel: actor_critic_forward.1
= control target key start
LH: loop header
LB: loop body
LE: loop exit
PB: predicated region body
PF: predicated region fallthrough
CT: control target
= control target key end

     0   :  { %9 = vsyncpa [#allocation4], 0  ;;  %s403_s15 = smov [#allocation3]   ;;  %s404_s17 = smov 256   ;;  %s479_s0 = inlined_call_operand.<no memory space> [shape: s32[1], index: 0, kind: input, shape index: {}]   ;;  %s480_s1 = inlined_call_operand.vmem [shape: f32[2,256], index: 1, kind: input, shape index: {}]   ;;  %s481_s2 = inlined_call_operand.hbm [shape: f32[520,256], index: 2, kind: input, shape index: {}]   ;;  %s482_s3 = inlined_call_operand.vmem [shape: f32[2,256], index: 3, kind: output, shape index: {}]  }
   0x1   :  { %s18_s14 = sshll.u32 %s481_s2, 4  ;;  %s20_s16 = sshll.u32 %s403_s15, 4  ;;  %s19_s14 = int_to_ptr.hbm [resolvable:$true] %s18_s14  ;;  %s21_s16 = int_to_ptr.vmem [resolvable:$true] %s20_s16 }
   0x2   :  { %s405_s18 = smov 16  }
   0x3   :  { %26 = dma.hbm_to_vmem [thread:$0]  %s19_s14, 16640, %s21_s16, [#allocation4], %s404_s17, %s404_s17, %s405_s18  }
   0x4   :  { %401 = dma.done.wait [#allocation4], 16640  }
   0x5   :  { %402 = vsyncadd [#allocation4], 4294950656  ;;  %v49_v0 = vld [vmem:[#allocation3 + $0xf0] sm:$0xff]  ;;  %v48_v1 = vld [vmem:[#allocation3 + $0xe0] sm:$0xff]  ;;  %vm123_vm0 = vcmask 523264   ;;  %vm147_vm1 = vcmask 1041408   ;;  %v151_v54 = vlaneseq }
   0x6   :  { %v65_v2 = vld [vmem:[#allocation3 + $0x1f0] sm:$0xff]  ;;  %73 = vmatpush.msra.mxu0 %v49_v0  ;;  %v64_v3 = vld [vmem:[#allocation3 + $0x1e0] sm:$0xff]  ;;  %v437_v14 = vld [vmem:[%s480_s1] sm:$0xf]  ;;  %s362_s23 = sshll.u32 %s479_s0, 4  ;;  %s407_s0 = smov 96  }
   0x7   :  { %93 = vmatpush.msra.mxu1 %v65_v2  ;;  %v47_v4 = vld [vmem:[#allocation3 + $0xd0] sm:$0xff]  ;;  %v46_v6 = vld [vmem:[#allocation3 + $0xc0] sm:$0xff]  ;;  %68 = vst [vmem:[#allocation1] ss:$4 sm:$0xff] %v437_v14  ;;  %v453_v55 = vand.u32 127, %v151_v54  ;;  %v204_v62 = vld [vmem:[#allocation3 + $0x378] sm:$0xff] }
   0x8   :  { %v63_v5 = vld [vmem:[#allocation3 + $0x1d0] sm:$0xff]  ;;  %74 = vmatpush.msra.mxu0 %v48_v1  ;;  %v62_v7 = vld [vmem:[#allocation3 + $0x1c0] sm:$0xff]  ;;  %v202_v0 = vld [vmem:[#allocation3 + $0x368] sm:$0xff]  ;;  %s247_s24 = sadd.s32 96, %s362_s23  ;;  %s252_s25 = sadd.s32 112, %s362_s23 }
   0x9   :  { %94 = vmatpush.msra.mxu1 %v64_v3  ;;  %v45_v8 = vld [vmem:[#allocation3 + $0xb0] sm:$0xff]  ;;  %v44_v10 = vld [vmem:[#allocation3 + $0xa0] sm:$0xff]  ;;  %v200_v2 = vld [vmem:[#allocation3 + $0x358] sm:$0xff]  ;;  %s248_s26 = sadd.s32 160, %s362_s23  ;;  %s261_s27 = sadd.s32 176, %s362_s23 }
   0xa   :  { %75 = vmatpush.msra.mxu0 %v47_v4  ;;  %v61_v9 = vld [vmem:[#allocation3 + $0x1b0] sm:$0xff]  ;;  %v60_v11 = vld [vmem:[#allocation3 + $0x1a0] sm:$0xff]  ;;  %v198_v4 = vld [vmem:[#allocation3 + $0x348] sm:$0xff]  ;;  %s408_s28 = smov 32   ;;  %s409_s4 = smov 64  }
   0xb   :  { %95 = vmatpush.msra.mxu1 %v63_v5  ;;  %v43_v12 = vld [vmem:[#allocation3 + $0x90] sm:$0xff]  ;;  %v120_v16 = vld [vmem:[#allocation3 + $0x260] sm:$0xff] }
   0xc   :  { %76 = vmatpush.msra.mxu0 %v46_v6  ;;  %v59_v13 = vld [vmem:[#allocation3 + $0x190] sm:$0xff]  ;;  %v42_v17 = vld [vmem:[#allocation3 + $0x80] sm:$0xff]  ;;  %v196_v6 = vld [vmem:[#allocation3 + $0x338] sm:$0xff] }
   0xd   :  { %96 = vmatpush.msra.mxu1 %v62_v7  ;;  %v121_v15 = vld [vmem:[#allocation3 + $0x270] sm:$0xff]  ;;  %v58_v18 = vld [vmem:[#allocation3 + $0x180] sm:$0xff] }
   0xe   :  { %77 = vmatpush.msra.mxu0 %v45_v8  ;;  %135 = vmatpush.msra.mxu2 %v121_v15  ;;  %v41_v19 = vld [vmem:[#allocation3 + $0x70] sm:$0xff]  ;;  %v40_v21 = vld [vmem:[#allocation3 + $0x60] sm:$0xff]  ;;  %v69_v25 = vld.sshfl [vmem:[#allocation1] sm:$0xff pattern:$0x73625140] }
   0xf   :  { %97 = vmatpush.msra.mxu1 %v61_v9  ;;  %v57_v20 = vld [vmem:[#allocation3 + $0x170] sm:$0xff]  ;;  %v56_v22 = vld [vmem:[#allocation3 + $0x160] sm:$0xff]  ;;  %v194_v8 = vld [vmem:[#allocation3 + $0x328] sm:$0xff] }
  0x10   :  { %78 = vmatpush.msra.mxu0 %v44_v10  ;;  %136 = vmatpush.msra.mxu2 %v120_v16  ;;  %v39_v23 = vld [vmem:[#allocation3 + $0x50] sm:$0xff]  ;;  %v70_v26 = vld.sshfl [vmem:[#allocation1 + $0x8] sm:$0xff pattern:$0x73625140]  ;;  %v192_v10 = vld [vmem:[#allocation3 + $0x318] sm:$0xff] }
  0x11   :  { %98 = vmatpush.msra.mxu1 %v60_v11  ;;  %v55_v24 = vld [vmem:[#allocation3 + $0x150] sm:$0xff]  ;;  %269 = vst [vmem:[#allocation1] ss:$4 sm:$0xff] %v437_v14  ;;  %v38_v27 = vld [vmem:[#allocation3 + $0x40] sm:$0xff]  ;;  %v188_v15 = vld [vmem:[#allocation3 + $0x2f8] sm:$0xff] }
  0x12   :  { %79 = vmatpush.msra.mxu0 %v43_v12  ;;  %v54_v28 = vld [vmem:[#allocation3 + $0x140] sm:$0xff]  ;;  %v37_v29 = vld [vmem:[#allocation3 + $0x30] sm:$0xff]  ;;  %v190_v12 = vld [vmem:[#allocation3 + $0x308] sm:$0xff] }
  0x13   :  { %99 = vmatpush.msra.mxu1 %v59_v13  ;;  %v53_v30 = vld [vmem:[#allocation3 + $0x130] sm:$0xff]  ;;  %v36_v31 = vld [vmem:[#allocation3 + $0x20] sm:$0xff] }
  0x14   :  { %80 = vmatpush.msra.mxu0 %v42_v17  ;;  %v52_v32 = vld [vmem:[#allocation3 + $0x120] sm:$0xff]  ;;  %v35_v33 = vld [vmem:[#allocation3 + $0x10] sm:$0xff]  ;;  %v186_v17 = vld [vmem:[#allocation3 + $0x2e8] sm:$0xff] }
  0x15   :  { %100 = vmatpush.msra.mxu1 %v58_v18  ;;  %v51_v34 = vld [vmem:[#allocation3 + $0x110] sm:$0xff]  ;;  %v34_v35 = vld [vmem:[#allocation3] sm:$0xff] }
  0x16   :  { %81 = vmatpush.msra.mxu0 %v41_v19  ;;  %v50_v36 = vld [vmem:[#allocation3 + $0x100] sm:$0xff]  ;;  %v119_v37 = vld [vmem:[#allocation3 + $0x250] sm:$0xff]  ;;  %v184_v19 = vld [vmem:[#allocation3 + $0x2d8] sm:$0xff] }
  0x17   :  { %101 = vmatpush.msra.mxu1 %v57_v20  ;;  %137 = vmatpush.msra.mxu2 %v119_v37  ;;  %v118_v38 = vld [vmem:[#allocation3 + $0x240] sm:$0xff]  ;;  %v117_v39 = vld [vmem:[#allocation3 + $0x230] sm:$0xff] }
  0x18   :  { %82 = vmatpush.msra.mxu0 %v40_v21  ;;  %v116_v40 = vld [vmem:[#allocation3 + $0x220] sm:$0xff]  ;;  %v115_v41 = vld [vmem:[#allocation3 + $0x210] sm:$0xff]  ;;  %v182_v21 = vld [vmem:[#allocation3 + $0x2c8] sm:$0xff] }
  0x19   :  { %102 = vmatpush.msra.mxu1 %v56_v22  ;;  %138 = vmatpush.msra.mxu2 %v118_v38  ;;  %v114_v42 = vld [vmem:[#allocation3 + $0x200] sm:$0xff]  ;;  %v203_v61 = vld [vmem:[#allocation3 + $0x370] sm:$0xff] }
  0x1a   :  { %83 = vmatpush.msra.mxu0 %v39_v23  ;;  %v441_v43 = vld [vmem:[#allocation3 + $0x400] sm:$0xff]  ;;  %205 = vmatpush.msra.mxu3 %v203_v61  ;;  %v199_v1 = vld [vmem:[#allocation3 + $0x350] sm:$0xff]  ;;  %v180_v23 = vld [vmem:[#allocation3 + $0x2b8] sm:$0xff] }
  0x1b   :  { %103 = vmatpush.msra.mxu1 %v55_v24  ;;  %139 = vmatpush.msra.mxu2 %v117_v39  ;;  %v66_v44 = vperm.slane %v441_v43, 0  ;;  %v122_v50 = vperm.slane %v441_v43, 1  ;;  %v201_v63 = vld [vmem:[#allocation3 + $0x360] sm:$0xff]  ;;  %v195_v5 = vld [vmem:[#allocation3 + $0x330] sm:$0xff]  ;;  %v406_v39 = vmov 1.0  }
  0x1c   :  { %84 = vmatpush.msra.mxu0 %v38_v27  ;;  %206 = vmatpush.msra.mxu3 %v201_v63  ;;  %v197_v3 = vld [vmem:[#allocation3 + $0x340] sm:$0xff]  ;;  %v191_v9 = vld [vmem:[#allocation3 + $0x310] sm:$0xff] }
  0x1d   :  { %104 = vmatpush.msra.mxu1 %v54_v28  ;;  %140 = vmatpush.msra.mxu2 %v116_v40  ;;  %v193_v7 = vld [vmem:[#allocation3 + $0x320] sm:$0xff]  ;;  %v187_v13 = vld [vmem:[#allocation3 + $0x2f0] sm:$0xff]  ;;  %v270_v40 = vld.sshfl [vmem:[#allocation1] sm:$0xff pattern:$0x73625140] }
  0x1e   :  { %85 = vmatpush.msra.mxu0 %v37_v29  ;;  %207 = vmatpush.msra.mxu3 %v199_v1  ;;  %v189_v11 = vld [vmem:[#allocation3 + $0x300] sm:$0xff]  ;;  %v183_v18 = vld [vmem:[#allocation3 + $0x2d0] sm:$0xff]  ;;  %v178_v29 = vld [vmem:[#allocation3 + $0x2a8] sm:$0xff] }
  0x1f   :  { %105 = vmatpush.msra.mxu1 %v53_v30  ;;  %141 = vmatpush.msra.mxu2 %v115_v41  ;;  %v185_v16 = vld [vmem:[#allocation3 + $0x2e0] sm:$0xff]  ;;  %v179_v22 = vld [vmem:[#allocation3 + $0x2b0] sm:$0xff] }
  0x20   :  { %86 = vmatpush.msra.mxu0 %v36_v31  ;;  %208 = vmatpush.msra.mxu3 %v197_v3  ;;  %v181_v20 = vld [vmem:[#allocation3 + $0x2c0] sm:$0xff]  ;;  %v175_v30 = vld [vmem:[#allocation3 + $0x290] sm:$0xff]  ;;  %v176_v31 = vld [vmem:[#allocation3 + $0x298] sm:$0xff] }
  0x21   :  { %106 = vmatpush.msra.mxu1 %v52_v32  ;;  %142 = vmatpush.msra.mxu2 %v114_v42  ;;  %v177_v28 = vld [vmem:[#allocation3 + $0x2a0] sm:$0xff]  ;;  %v287_v42 = vld [vmem:[#allocation3 + $0x3f0] sm:$0xff] }
  0x22   :  { %87 = vmatpush.msra.mxu0 %v35_v33  ;;  %209 = vmatpush.msra.mxu3 %v195_v5  ;;  %v173_v32 = vld [vmem:[#allocation3 + $0x280] sm:$0xff]  ;;  %v174_v33 = vld [vmem:[#allocation3 + $0x288] sm:$0xff]  ;;  %v281_v54 = vld [vmem:[#allocation3 + $0x390] sm:$0xff]  ;;  %v319_v5 = vperm.slane %v441_v43, 2 }
  0x23   :  { %107 = vmatpush.msra.mxu1 %v51_v34  ;;  %225 = vmatpush.msrb.mxu2 %v204_v62  ;;  %v271_v41 = vld.sshfl [vmem:[#allocation1 + $0x8] sm:$0xff pattern:$0x73625140] }
  0x24   :  { %88 = vmatpush.msra.mxu0 %v34_v35  ;;  %210 = vmatpush.msra.mxu3 %v193_v7  ;;  %276 = vst [vmem:[#allocation1] ss:$4 sm:$0xff] %v437_v14  ;;  %v249_v14 = vstv %s247_s24 }
  0x25   :  { %108 = vmatpush.msra.mxu1 %v50_v36  ;;  %89 = vmatmul.f32.vlgmr.msra.gmra.mxu0 %v69_v25  ;;  %vm250_vm12 = vcmp.ge.s32.totalorder %v453_v55, %v249_v14 }
  0x26   :  { %109 = vmatmul.f32.vlgmr.msra.gmra.mxu1 %v70_v26  ;;  %226 = vmatpush.msrb.mxu2 %v202_v0 }
  0x27   :  { %211 = vmatpush.msra.mxu3 %v191_v9  ;;  %301 = vmatpush.msrb.mxu0 %v287_v42 }
  0x28   :  { %227 = vmatpush.msrb.mxu2 %v200_v2 }
  0x29   :  { %212 = vmatpush.msra.mxu3 %v189_v11 }
  0x2a   :  { %228 = vmatpush.msrb.mxu2 %v198_v4 }
  0x2b   :  { %213 = vmatpush.msra.mxu3 %v187_v13  ;;  %v410_v13 = vmov 64  }
  0x2c   :  { %229 = vmatpush.msrb.mxu2 %v196_v6  ;;  %372 = vset.pattern.permute.xlu0 %v410_v13 }
  0x2d   :  { %214 = vmatpush.msra.mxu3 %v185_v16 }
  0x2e   :  { %230 = vmatpush.msrb.mxu2 %v194_v8 }
  0x2f   :  { %215 = vmatpush.msra.mxu3 %v183_v18 }
  0x30   :  { %231 = vmatpush.msrb.mxu2 %v192_v10 }
  0x31   :  { %216 = vmatpush.msra.mxu3 %v181_v20 }
  0x32   :  { %232 = vmatpush.msrb.mxu2 %v190_v12 }
  0x33   :  { %217 = vmatpush.msra.mxu3 %v179_v22 }
  0x34   :  { %233 = vmatpush.msrb.mxu2 %v188_v15 }
  0x35   :  { %218 = vmatpush.msra.mxu3 %v177_v28 }
  0x36   :  { %234 = vmatpush.msrb.mxu2 %v186_v17 }
  0x37   :  { %219 = vmatpush.msra.mxu3 %v175_v30 }
  0x38   :  { %235 = vmatpush.msrb.mxu2 %v184_v19 }
  0x39   :  { %220 = vmatpush.msra.mxu3 %v173_v32 }
  0x3a   :  { %236 = vmatpush.msrb.mxu2 %v182_v21 }
  0x3c   :  { %237 = vmatpush.msrb.mxu2 %v180_v23 }
  0x3e   :  { %238 = vmatpush.msrb.mxu2 %v178_v29 }
  0x40   :  { %239 = vmatpush.msrb.mxu2 %v176_v31 }
  0x42   :  { %240 = vmatpush.msrb.mxu2 %v174_v33 }
  0xa2   :  { %v90_v45 = vpop.f32.mrf.mxu0 }
  0xa3   :  { %v110_v46 = vpop.f32.mrf.mxu1  ;;  %v91_v47 = vadd.f32 %v90_v45, %v66_v44  ;;  %v286_v44 = vld [vmem:[#allocation3 + $0x3e0] sm:$0xff]  ;;  %v285_v45 = vld [vmem:[#allocation3 + $0x3d0] sm:$0xff] }
  0xa4   :  { %302 = vmatpush.msrb.mxu0 %v286_v44 }
  0xa5   :  { %v444_v48 = vadd.f32 %v110_v46, %v91_v47  ;;  %v284_v46 = vld [vmem:[#allocation3 + $0x3c0] sm:$0xff]  ;;  %v283_v47 = vld [vmem:[#allocation3 + $0x3b0] sm:$0xff] }
  0xa6   :  { %303 = vmatpush.msrb.mxu0 %v285_v45 }
  0xa7   :  { %373 = vtanh.f32 %v444_v48 }
  0xa8   :  { %304 = vmatpush.msrb.mxu0 %v284_v46 }
  0xaa   :  { %305 = vmatpush.msrb.mxu0 %v283_v47 }
  0xad   :  { %v374_v49 = vpop.eup %373 }
  0xae   :  { %358 = vmatmul.msk.f32.vlgmr.msra.gmra.mxu2 %vm123_vm0, %v374_v49  ;;  %v245_v49 = vadd.s32 128, %v453_v55 }
  0xb0   :  { %vm251_vm5 = vcmp.ge.s32.totalorder %v245_v49, %v249_v14 }
 0x131   :  { %v144_v51 = vpop.f32.mrf.mxu2 }
 0x132   :  { %v145_v52 = vadd.f32 %v144_v51, %v122_v50  ;;  %v253_v50 = vstv %s252_s25  ;;  %v282_v51 = vld [vmem:[#allocation3 + $0x3a0] sm:$0xff] }
 0x133   :  { %vm255_vm6 = vcmp.lt.s32.totalorder %v245_v49, %v253_v50  ;;  %306 = vmatpush.msrb.mxu0 %v282_v51  ;;  %vm254_vm13 = vcmp.lt.s32.totalorder %v453_v55, %v253_v50 }
 0x134   :  { %334 = vst [vmem:[%s482_s3] sm:$0x3] %v145_v52  ;;  %v148_v53 = vsel %vm147_vm1, %v145_v52, -inf  ;;  %vm257_vm9 = vmand %vm251_vm5, %vm255_vm6  ;;  %vm342_vm5 = vcmask 261120   ;;  %vm329_vm6 = vcmask 517120  }
 0x135   :  { %149 = vmax.xlane.f32.xlu0 %v148_v53  ;;  %v262_v53 = vstv %s261_s27  ;;  %307 = vmatpush.msrb.mxu0 %v281_v54 }
 0x136   :  { %vm264_vm8 = vcmp.lt.s32.totalorder %v245_v49, %v262_v53  ;;  %vm263_vm15 = vcmp.lt.s32.totalorder %v453_v55, %v262_v53 }
 0x1a8   :  { %v150_v56 = vpop.xlane.xlu0 %149 }
 0x1a9   :  { %vm153_vm2 = vcmp.eq.f32.partialorder %v145_v52, %v150_v56  ;;  %v258_v52 = vstv %s248_s26  ;;  %v280_v56 = vld [vmem:[#allocation3 + $0x380] sm:$0xff] }
 0x1aa   :  { %v154_v57 = vsel %vm153_vm2, %v453_v55, 128  ;;  %vm260_vm7 = vcmp.ge.s32.totalorder %v245_v49, %v258_v52  ;;  %308 = vmatpush.msrb.mxu0 %v280_v56  ;;  %vm259_vm14 = vcmp.ge.s32.totalorder %v453_v55, %v258_v52  ;;  %vm256_vm2 = vmand %vm250_vm12, %vm254_vm13 }
 0x1ab   :  { %v155_v58 = vsel %vm147_vm1, %v154_v57, 2147483647  ;;  %vm266_vm10 = vmand %vm260_vm7, %vm264_vm8  ;;  %v277_v57 = vld.sshfl [vmem:[#allocation1 + $0x8] sm:$0xff pattern:$0x73625140] }
 0x1ac   :  { %v157_v59 = vshra.s32 %v155_v58, 16  ;;  %v156_v24 = vand.u32 65535, %v155_v58  ;;  %vm268_vm11 = vmor %vm257_vm9, %vm266_vm10 }
 0x1ae   :  { %v159_v60 = vcvt.s32.f32 %v157_v59  ;;  %v158_v26 = vcvt.s32.f32 %v156_v24 }
 0x1b0   :  { %160 = vmin.xlane.f32.xlu0 %v159_v60 }
 0x223   :  { %v161_v25 = vpop.xlane.xlu0 %160 }
 0x224   :  { %vm162_vm3 = vcmp.eq.f32.partialorder %v159_v60, %v161_v25  ;;  %v167_v34 = vcvt.f32.s32 %v161_v25 }
 0x225   :  { %v163_v27 = vsel %vm162_vm3, %v158_v26, inf  ;;  %vm265_vm3 = vmand %vm259_vm14, %vm263_vm15 }
 0x226   :  { %164 = vmin.xlane.f32.xlu1 %v163_v27  ;;  %v168_v36 = vshll.u32 %v167_v34, 16 }
 0x299   :  { %v165_v35 = vpop.xlane.xlu1 %164 }
 0x29a   :  { %v166_v37 = vcvt.f32.s32 %v165_v35 }
 0x29c   :  { %v169_v38 = vadd.s32 %v168_v36, %v166_v37 }
 0x29e   :  { %vm170_vm4 = vcmp.eq.s32.totalorder %v453_v55, %v169_v38 }
 0x29f   :  { %360 = vmatmul.msk.f32.vlgmr.msra.gmra.mxu3 %vm170_vm4, %v406_v39  ;;  %361 = vmatmul.msk.f32.vlgmr.msrb.gmra.mxu2 %vm170_vm4, %v406_v39  ;;  %vm267_vm4 = vmor %vm256_vm2, %vm265_vm3 }
 0x322   :  { %v242_v58 = vpop.f32.mrf.mxu2  ;;  %v222_v61 = vpop.f32.mrf.mxu3 }
 0x323   :  { %v275_v59 = vsel %vm268_vm11, %v242_v58, %v271_v41  ;;  %v274_v63 = vsel %vm267_vm4, %v222_v61, %v270_v40 }
 0x324   :  { %v279_v60 = vsub.f32 %v275_v59, %v277_v57  ;;  %v337_v62 = vrot.slane %v275_v59, 6 }
 0x326   :  { %289 = vrot.lane.b32.xlu1 %v279_v60, %s407_s0  ;;  %v338_v0 = vsel %vm147_vm1, %v274_v63, %v337_v62 }
 0x32e   :  { %339 = vrot.lane.b32.xlu1 %v338_v0, %s408_s28 }
 0x398   :  { %v290_v1 = vpop.permute.xlu1 %289 }
 0x399   :  { %363 = vmatmul.msk.f32.vlgmr.msrb.gmra.mxu0 %vm123_vm0, %v290_v1  ;;  %vm351_vm0 = vcmask 1041920  }
 0x3a0   :  { %v340_v2 = vpop.permute.xlu1 %339 }
 0x3a1   :  { %v341_v55 = vrot.slane %v340_v2, 2 }
 0x3a3   :  { %v343_v3 = vsel %vm342_vm5, %v340_v2, %v341_v55 }
 0x3a4   :  { %345 = vst.msk [vmem:[%s482_s3 + $0x2] sm:$0x3] %vm329_vm6, %v343_v3 }
 0x416   :  { %v310_v4 = vpop.f32.mrf.mxu0 }
 0x417   :  { %314 = vrot.lane.b32.xlu2 %v310_v4, %s409_s4 }
 0x41f   :  { %321 = vrot.lane.b32.xlu2 %v319_v5, %s409_s4 }
 0x471   :  { %v315_v6 = vpop.permute.xlu2 %314 }
 0x472   :  { %v317_v7 = vadd.f32 %v315_v6, %v444_v48 }
 0x474   :  { %375 = vtanh.f32 %v317_v7 }
 0x479   :  { %v322_v8 = vpop.permute.xlu2 %321 }
 0x47a   :  { %v376_v9 = vpop.eup %375 }
 0x47b   :  { %v324_v10 = vmul.f32 %v376_v9, %v322_v8 }
 0x47d   :  { %326 = vrot.lane.b32.xlu0 %v324_v10, %s409_s4 }
 0x4ef   :  { %v327_v11 = vpop.permute.xlu0 %326 }
 0x4f0   :  { %v330_v12 = vsel %vm329_vm6, %v327_v11, 0.0 }
 0x4f1   :  { %331 = vadd.xlane.f32.xlu2 %v330_v12 }
 0x564   :  { %v332_v15 = vpop.xlane.xlu2 %331 }
 0x565   :  { %v333_v16 = vadd.f32 %v332_v15, %v319_v5 }
 0x567   :  { %348 = vperm.xlu0 %372, %v333_v16  }
 0x5d9   :  { %v349_v43 = vpop.permute.xlu0 %348 }
 0x5da   :  { %352 = vst.msk [vmem:[%s482_s3 + $0x2] sm:$0x3] %vm351_vm0, %v349_v43 }
 0x5db   :  { %357 = vsyncpa [#allocation4], 1 }

</bundles_post_ra>
